<compile_context>
chip_gen: v6e
topology: v6e:2x2x1
jax: 0.10.0
libtpu: 0.0.40
codegen_flags: <defaults>
</compile_context>

<pallas_src>
import math

import jax
import jax.numpy as jnp
from jax.experimental import pallas as pl
from jax.experimental.pallas import tpu as pltpu


def make_brain_kernel(n_linear, compute_dtype=jnp.float32):
    """Kernel for an MLP with `n_linear` Linear layers.

    Ref layout: (x_ref, w0, b0, ..., w_{L-1}, b_{L-1}, out_ref).
    ReLU after every layer except the last; tanh on the final output.
    Activations live as [features, TB] (batch on lanes).  The last layer
    (out_features == 1) is applied as a VPU broadcast-multiply by its [H, 1]
    weight column plus a sublane sum instead of an M=1 MXU matmul, producing
    the lane-dense (1, TB) output row directly.
    """

    def kernel(*refs):
        x_ref = refs[0]          # [TB, num_rays]  (batch on sublanes)
        o_ref = refs[-1]         # [1, TB]         (lane-dense)

        # --- First layer: NT dot_general, contract both operands on their
        #     feature axis -> result is [out0, TB] (batch lands on lanes).
        w0 = refs[1][...].astype(compute_dtype)          # [out0, in]
        b0 = refs[2][...]                                 # [out0, 1] f32
        h = jax.lax.dot_general(
            w0, x_ref[...].astype(compute_dtype),
            dimension_numbers=(((1,), (1,)), ((), ())),
            preferred_element_type=jnp.float32,
        ) + b0
        if n_linear > 1:
            h = jnp.maximum(h, 0.0).astype(compute_dtype)  # ReLU (VPU)

        # --- Middle hidden layers: plain W @ h on the MXU, f32 accumulate.
        for li in range(1, n_linear - 1):
            w = refs[1 + 2 * li][...].astype(compute_dtype)  # [out, in]
            b = refs[2 + 2 * li][...]                        # [out, 1] f32
            h = jnp.dot(w, h, preferred_element_type=jnp.float32) + b
            h = jnp.maximum(h, 0.0).astype(compute_dtype)

        # --- Output layer (out_features == 1): VPU mul + sublane reduce.
        if n_linear > 1:
            w_col = refs[2 * n_linear - 1][...]              # [H, 1] f32
            b_out = refs[2 * n_linear][...]                  # [1, 1] f32
            y = jnp.sum(h.astype(jnp.float32) * w_col, axis=0, keepdims=True)
            y = y + b_out
        else:
            y = h                                            # already [1, TB]

        o_ref[...] = jnp.tanh(y)                             # tanh -> EUP

    return kernel


def brain_forward(x, params, *, tb=2048, compute_dtype=jnp.float32):
    """x: [B, num_rays] float32; params: list of (W[out, in], b[out]) (PyTorch layout).

    tb: max batch tile.  Must be a multiple of 128 when it is smaller than B
    (for the lane-dense output block); clamped to B for tiny inputs, where the
    blocks equal the full array dims and no alignment applies.
    compute_dtype: MXU input dtype (bf16 recommended on v6e/v7x).  f32 accum.
    """
    B, num_rays = x.shape
    n_linear = len(params)
    assert n_linear >= 1
    assert params[-1][0].shape[0] == 1, "Brain's output layer has 1 feature"

    # Tile selection.  For B <= tb a single full-array block sidesteps the
    # (8, 128) alignment rule; otherwise keep tb a multiple of 128 so the
    # (1, tb) output block is lane-aligned (also a multiple of 16 sublanes for
    # the bf16 x tile).  For B > tb the grid automatically has >= 2 steps,
    # which is what v7x needs to use both TensorCores.
    if B <= tb:
        tb = B
    else:
        tb = max(128, (tb // 128) * 128)
    grid = (pl.cdiv(B, tb),)

    const_map = lambda i: (0, 0)  # weights/biases: same (whole) block each step

    # Cast the only large HBM stream in the wrapper (halves DMA bytes on bf16).
    x_in = x if compute_dtype == jnp.float32 else x.astype(compute_dtype)

    flat_args = [x_in]
    in_specs = [pl.BlockSpec((tb, num_rays), lambda i: (i, 0))]
    for li, (w, b) in enumerate(params):
        if li == n_linear - 1 and n_linear > 1:
            w_arg = w.reshape(-1, 1)             # [1, H] -> [H, 1] column, f32
        else:
            w_arg = w.astype(compute_dtype)      # [out, in] for the MXU
        b_arg = b.reshape(-1, 1)                 # [out, 1] f32 column
        flat_args += [w_arg, b_arg]
        in_specs += [
            pl.BlockSpec(w_arg.shape, const_map),   # whole array, VMEM-resident
            pl.BlockSpec(b_arg.shape, const_map),
        ]

    # Advisory cost estimate (actual dtypes, VPU final layer still ~2*B*H flops).
    dims = [num_rays] + [w.shape[0] for w, _ in params]
    flops = 2 * B * sum(dims[i] * dims[i + 1] for i in range(len(dims) - 1))
    bytes_accessed = x_in.nbytes + sum(a.nbytes for a in flat_args[1:]) + B * 4
    cost = pl.CostEstimate(
        flops=flops, transcendentals=B, bytes_accessed=bytes_accessed
    )

    kernel = make_brain_kernel(n_linear, compute_dtype)
    out = pl.pallas_call(
        kernel,
        out_shape=jax.ShapeDtypeStruct((1, B), jnp.float32),
        grid=grid,
        in_specs=in_specs,
        out_specs=pl.BlockSpec((1, tb), lambda i: (0, i)),
        compiler_params=pltpu.CompilerParams(
            # Batch steps are independent -> shard across v7x's 2 TensorCores.
            dimension_semantics=("parallel",),
            # vmem_limit_bytes left unset on purpose: even tb=8192 double-
            # buffered (x tiles + resident weights + out rows) is < 3 MiB.
        ),
        cost_estimate=cost,
    )(*flat_args)

    # (1, B) -> (B, 1): row-major-preserving reshape (no transpose of data).
    return out.reshape(B, 1)


def init_brain_params(key, num_rays, hidden_layers):
    """Xavier-uniform weights (PyTorch gain=1), zero biases.

    Returns list of (W[out, in], b[out]) in PyTorch layout, mirroring
    Brain.randomize_weights().
    """
    dims = [num_rays] + list(hidden_layers) + [1]
    params = []
    for i in range(len(dims) - 1):
        fan_in, fan_out = dims[i], dims[i + 1]
        key, sub = jax.random.split(key)
        limit = math.sqrt(6.0 / (fan_in + fan_out))
        w = jax.random.uniform(
            sub, (fan_out, fan_in), jnp.float32, minval=-limit, maxval=limit
        )
        b = jnp.zeros((fan_out,), jnp.float32)
        params.append((w, b))
    return params


def brain_forward_ref(x, params):
    """Pure-JAX reference of Brain.forward for correctness check."""
    h = x
    n = len(params)
    for i, (w, b) in enumerate(params):
        h = h @ w.T + b
        if i < n - 1:
            h = jnp.maximum(h, 0.0)
    return jnp.tanh(h)


# TODO(synk): Brain.think / Brain.mutate are host-side control utilities
# (scalar extraction, in-place parameter noise) and are not part of the
# forward pass; they are intentionally not kernelized.


if __name__ == "__main__":
    num_rays = 8
    hidden_layers = [32, 16]
    batch = 2

    key = jax.random.PRNGKey(0)
    key_x, key_p, key_x2 = jax.random.split(key, 3)

    x = jax.random.uniform(key_x, (batch, num_rays), jnp.float32)  # ray distances
    params = init_brain_params(key_p, num_rays, hidden_layers)

    out = brain_forward(x, params)
    jax.block_until_ready(out)

    ref = brain_forward_ref(x, params)
    assert out.shape == (batch, 1)
    assert jnp.allclose(out, ref, atol=1e-5, rtol=1e-5)

    # Multi-step grid + ragged last block (no wrapper padding) sanity check.
    big_b = 300
    x2 = jax.random.uniform(key_x2, (big_b, num_rays), jnp.float32)
    out2 = brain_forward(x2, params, tb=128)   # grid = 3, last block ragged
    jax.block_until_ready(out2)
    ref2 = brain_forward_ref(x2, params)
    assert out2.shape == (big_b, 1)
    assert jnp.allclose(out2, ref2, atol=1e-5, rtol=1e-5)

    print("KERNEL_OK")
</pallas_src>

<mosaic_0001>
module attributes {stable_mosaic.version = 11 : i64} {
  func.func @kernel(%arg0: i32, %arg1: memref<2x8xf32, #tpu.memory_space<vmem>>, %arg2: memref<32x8xf32, #tpu.memory_space<vmem>>, %arg3: memref<32x1xf32, #tpu.memory_space<vmem>>, %arg4: memref<16x32xf32, #tpu.memory_space<vmem>>, %arg5: memref<16x1xf32, #tpu.memory_space<vmem>>, %arg6: memref<16x1xf32, #tpu.memory_space<vmem>>, %arg7: memref<1x1xf32, #tpu.memory_space<vmem>>, %arg8: memref<1x2xf32, #tpu.memory_space<vmem>>) attributes {dimension_semantics = [#tpu.dimension_semantics<parallel>], iteration_bounds = array<i64: 1>, scalar_prefetch = 0 : i64, scratch_operands = 0 : i64, tpu.core_type = #tpu.core_type<tc>, window_params = [{transform_indices = @transform_0, window_bounds = array<i64: 2, 8>}, {pipeline_mode = #tpu.pipeline_mode<synchronous>, transform_indices = @transform_1, window_bounds = array<i64: 32, 8>}, {pipeline_mode = #tpu.pipeline_mode<synchronous>, transform_indices = @transform_2, window_bounds = array<i64: 32, 1>}, {pipeline_mode = #tpu.pipeline_mode<synchronous>, transform_indices = @transform_3, window_bounds = array<i64: 16, 32>}, {pipeline_mode = #tpu.pipeline_mode<synchronous>, transform_indices = @transform_4, window_bounds = array<i64: 16, 1>}, {pipeline_mode = #tpu.pipeline_mode<synchronous>, transform_indices = @transform_5, window_bounds = array<i64: 16, 1>}, {pipeline_mode = #tpu.pipeline_mode<synchronous>, transform_indices = @transform_6, window_bounds = array<i64: 1, 1>}, {transform_indices = @transform_7, window_bounds = array<i64: 1, 2>}]} {
    %c0 = arith.constant 0 : index
    %c0_0 = arith.constant 0 : index
    %0 = vector.load %arg2[%c0, %c0_0] : memref<32x8xf32, #tpu.memory_space<vmem>>, vector<32x8xf32>
    %c0_1 = arith.constant 0 : index
    %c0_2 = arith.constant 0 : index
    %1 = vector.load %arg3[%c0_1, %c0_2] : memref<32x1xf32, #tpu.memory_space<vmem>>, vector<32x1xf32>
    %c0_3 = arith.constant 0 : index
    %c0_4 = arith.constant 0 : index
    %2 = vector.load %arg1[%c0_3, %c0_4] : memref<2x8xf32, #tpu.memory_space<vmem>>, vector<2x8xf32>
    %cst = arith.constant dense<0.000000e+00> : vector<32x2xf32>
    %3 = tpu.matmul %0, %2, %cst {dimension_numbers = #tpu.dot_dimension_numbers<[1], [1], [0], [0], [0, 0, 1, 0], [], []>} : vector<32x8xf32>, vector<2x8xf32>, vector<32x2xf32> -> vector<32x2xf32>
    %4 = vector.broadcast %1 : vector<32x1xf32> to vector<32x2xf32>
    %5 = arith.addf %3, %4 : vector<32x2xf32>
    %cst_5 = arith.constant 0.000000e+00 : f32
    %6 = vector.broadcast %cst_5 : f32 to vector<32x2xf32>
    %7 = arith.maximumf %5, %6 : vector<32x2xf32>
    %c0_6 = arith.constant 0 : index
    %c0_7 = arith.constant 0 : index
    %8 = vector.load %arg4[%c0_6, %c0_7] : memref<16x32xf32, #tpu.memory_space<vmem>>, vector<16x32xf32>
    %c0_8 = arith.constant 0 : index
    %c0_9 = arith.constant 0 : index
    %9 = vector.load %arg5[%c0_8, %c0_9] : memref<16x1xf32, #tpu.memory_space<vmem>>, vector<16x1xf32>
    %cst_10 = arith.constant dense<0.000000e+00> : vector<16x2xf32>
    %10 = tpu.matmul %8, %7, %cst_10 {dimension_numbers = #tpu.dot_dimension_numbers<[1], [0], [0], [1], [0, 0, 1, 1], [], []>} : vector<16x32xf32>, vector<32x2xf32>, vector<16x2xf32> -> vector<16x2xf32>
    %11 = vector.broadcast %9 : vector<16x1xf32> to vector<16x2xf32>
    %12 = arith.addf %10, %11 : vector<16x2xf32>
    %cst_11 = arith.constant 0.000000e+00 : f32
    %13 = vector.broadcast %cst_11 : f32 to vector<16x2xf32>
    %14 = arith.maximumf %12, %13 : vector<16x2xf32>
    %c0_12 = arith.constant 0 : index
    %c0_13 = arith.constant 0 : index
    %15 = vector.load %arg6[%c0_12, %c0_13] : memref<16x1xf32, #tpu.memory_space<vmem>>, vector<16x1xf32>
    %c0_14 = arith.constant 0 : index
    %c0_15 = arith.constant 0 : index
    %16 = vector.load %arg7[%c0_14, %c0_15] : memref<1x1xf32, #tpu.memory_space<vmem>>, vector<1x1xf32>
    %17 = vector.broadcast %15 : vector<16x1xf32> to vector<16x2xf32>
    %18 = arith.mulf %14, %17 : vector<16x2xf32>
    %cst_16 = arith.constant dense<0.000000e+00> : vector<2xf32>
    %19 = vector.multi_reduction <add>, %18, %cst_16 [0] : vector<16x2xf32> to vector<2xf32>
    %20 = vector.shape_cast %19 : vector<2xf32> to vector<1x2xf32>
    %21 = vector.broadcast %16 : vector<1x1xf32> to vector<1x2xf32>
    %22 = arith.addf %20, %21 : vector<1x2xf32>
    %23 = math.tanh %22 : vector<1x2xf32>
    %c0_17 = arith.constant 0 : index
    %c0_18 = arith.constant 0 : index
    %24 = vector.load %arg8[%c0_17, %c0_18] : memref<1x2xf32, #tpu.memory_space<vmem>>, vector<1x2xf32>
    tpu.vector_store %arg8[%c0_17, %c0_18], %23 {strides = array<i32>} : memref<1x2xf32, #tpu.memory_space<vmem>>, vector<1x2xf32>,
    return
  }
  func.func @transform_0(%arg0: i32) -> (i32, i32) {
    %c0_i32 = arith.constant 0 : i32
    %c0_i32_0 = arith.constant 0 : i32
    return %arg0, %c0_i32 : i32, i32
  }
  func.func @transform_1(%arg0: i32) -> (i32, i32) {
    %c0_i32 = arith.constant 0 : i32
    %c0_i32_0 = arith.constant 0 : i32
    %c0_i32_1 = arith.constant 0 : i32
    return %c0_i32, %c0_i32_0 : i32, i32
  }
  func.func @transform_2(%arg0: i32) -> (i32, i32) {
    %c0_i32 = arith.constant 0 : i32
    %c0_i32_0 = arith.constant 0 : i32
    %c0_i32_1 = arith.constant 0 : i32
    return %c0_i32, %c0_i32_0 : i32, i32
  }
  func.func @transform_3(%arg0: i32) -> (i32, i32) {
    %c0_i32 = arith.constant 0 : i32
    %c0_i32_0 = arith.constant 0 : i32
    %c0_i32_1 = arith.constant 0 : i32
    return %c0_i32, %c0_i32_0 : i32, i32
  }
  func.func @transform_4(%arg0: i32) -> (i32, i32) {
    %c0_i32 = arith.constant 0 : i32
    %c0_i32_0 = arith.constant 0 : i32
    %c0_i32_1 = arith.constant 0 : i32
    return %c0_i32, %c0_i32_0 : i32, i32
  }
  func.func @transform_5(%arg0: i32) -> (i32, i32) {
    %c0_i32 = arith.constant 0 : i32
    %c0_i32_0 = arith.constant 0 : i32
    %c0_i32_1 = arith.constant 0 : i32
    return %c0_i32, %c0_i32_0 : i32, i32
  }
  func.func @transform_6(%arg0: i32) -> (i32, i32) {
    %c0_i32 = arith.constant 0 : i32
    %c0_i32_0 = arith.constant 0 : i32
    %c0_i32_1 = arith.constant 0 : i32
    return %c0_i32, %c0_i32_0 : i32, i32
  }
  func.func @transform_7(%arg0: i32) -> (i32, i32) {
    %c0_i32 = arith.constant 0 : i32
    %c0_i32_0 = arith.constant 0 : i32
    return %c0_i32, %arg0 : i32, i32
  }
}

</mosaic_0001>

<bundles_post_ra>
// kernel: tpu_custom_call.1
= control target key start
LH: loop header
LB: loop body
LE: loop exit
PB: predicated region body
PF: predicated region fallthrough
CT: control target
= control target key end

     0   :  { %s479_s0 = inlined_call_operand.vmem [shape: f32[2,8], index: 0, kind: input, shape index: {}]   ;;  %s480_s1 = inlined_call_operand.vmem [shape: f32[32,8], index: 1, kind: input, shape index: {}]   ;;  %s481_s2 = inlined_call_operand.vmem [shape: f32[32,1], index: 2, kind: input, shape index: {}]   ;;  %s482_s3 = inlined_call_operand.vmem [shape: f32[16,32], index: 3, kind: input, shape index: {}]   ;;  %s483_s4 = inlined_call_operand.vmem [shape: f32[16,1], index: 4, kind: input, shape index: {}]   ;;  %s484_s5 = inlined_call_operand.vmem [shape: f32[16,1], index: 5, kind: input, shape index: {}]   ;;  %s485_s6 = inlined_call_operand.<no memory space> [shape: f32[1,1], index: 6, kind: input, shape index: {}]   ;;  %s486_s7 = inlined_call_operand.hbm [shape: f32[1,2], index: 7, kind: output, shape index: {}]  }
   0x1   :  { %v12_v0 = vstv %s485_s6 }
   0x2   :  { %13 = vst [vmem:[#allocation2] sm:$0x1] %v12_v0 }
   0x3   :  { %v37_v1 = vld [vmem:[%s479_s0] sm:$0x3]  ;;  %vm58_vm0 = vcmask 64512   ;;  %v36_v3 = vld [vmem:[%s481_s2 + $0x18] sm:$0xff]  ;;  %v30_v4 = vld [vmem:[%s480_s1 + $0x8] sm:$0xff]  ;;  %v378_v5 = vmov 0  }
   0x4   :  { %v29_v2 = vld [vmem:[%s480_s1] sm:$0xff]  ;;  %331 = vmatprep.subr.msk.mxu0 %vm58_vm0, %v37_v1  ;;  %352 = vset.pattern.permute.xlu0 %v378_v5  ;;  %v34_v6 = vld [vmem:[%s481_s2 + $0x8] sm:$0xff]  ;;  %v31_v7 = vld [vmem:[%s480_s1 + $0x10] sm:$0xff] }
   0x5   :  { %333 = vmatprep.mubr.msk.f32.mxu0 %vm58_vm0, %v29_v2  ;;  %332 = vmatpush3.xpose.msk.msra.mxu0 %vm58_vm0, %v37_v1  ;;  %v35_v8 = vld [vmem:[%s481_s2 + $0x10] sm:$0xff] }
   0x6   :  { %55 = vperm.xlu0 %352, %v36_v3   ;;  %353 = vset.pattern.permute.xlu1 %v378_v5 }
   0x7   :  { %45 = vperm.xlu1 %353, %v34_v6  }
   0x8   :  { %14 = vsyncpa [#allocation4], 0  ;;  %334 = vmatmul.mubr.msk.f32.vlgmr.msra.gmra.mxu0 %vm58_vm0, %v30_v4  ;;  %v33_v9 = vld [vmem:[%s481_s2] sm:$0xff]  ;;  %v32_v10 = vld [vmem:[%s480_s1 + $0x18] sm:$0xff]  ;;  %vm177_vm1 = vcmask 261120   ;;  %vm276_vm2 = vcmask 15360   ;;  %v291_v48 = vlaneseq }
   0x9   :  { %336 = vmatprep.mubr.msk.f32.mxu0 %vm58_vm0, %v31_v7  ;;  %v165_v11 = vld [vmem:[%s483_s4] sm:$0xff]  ;;  %v166_v12 = vld [vmem:[%s483_s4 + $0x8] sm:$0xff]  ;;  %vm297_vm3 = vcmask 8192  }
   0xa   :  { %50 = vperm.xlu0 %352, %v35_v8   ;;  %v261_v13 = vld [vmem:[%s484_s5] sm:$0xff]  ;;  %v262_v14 = vld [vmem:[%s484_s5 + $0x8] sm:$0xff]  ;;  %v292_v51 = vshrl.u32 %v291_v48, 7 }
   0xb   :  { %40 = vperm.xlu1 %353, %v33_v9   ;;  %v263_v15 = vld [vmem:[#allocation2] sm:$0x1]  ;;  %v164_v33 = vld [vmem:[%s482_s3 + $0x8] sm:$0xff] }
   0xc   :  { %337 = vmatmul.mubr.msk.f32.gmra.mxu0 %vm58_vm0, %v32_v10  ;;  %v163_v16 = vld [vmem:[%s482_s3] sm:$0xff]  ;;  %v293_v54 = vsub.s32 0, %v292_v51  ;;  %s379_s3 = smov [#allocation3]  }
   0xd   :  { %347 = vmatprep.mubr.msk.f32.mxu1 %vm177_vm1, %v163_v16  ;;  %s305_s27 = sshll.u32 %s379_s3, 4  ;;  %s306_s27 = int_to_ptr.vmem [resolvable:$true] %s305_s27 }
   0xe   :  { %169 = vperm.xlu0 %352, %v165_v11   ;;  %s356_s28 = scalar_lea.vmem %s306_s27, 16  ;;  %s360_s29 = scalar_lea.vmem %s306_s27, 32 }
   0xf   :  { %174 = vperm.xlu1 %353, %v166_v12   ;;  %p357_p0 = scmp.ne.s32.totalorder %s306_s27, %s356_s28  ;;  %p361_p1 = scmp.lt.s32.totalorder %s306_s27, %s306_s27 }
  0x10   :  { %p362_p2 = scmp.lt.s32.totalorder %s360_s29, %s356_s28 }
  0x12   :  { %266 = vperm.xlu0 %352, %v261_v13   ;;  %p363_p3 = por %p362_p2, %p361_p1 }
  0x13   :  { %271 = vperm.xlu1 %353, %v262_v14  }
  0x14   :  { %p364_p4 = pnand %p363_p3, %p357_p0 }
  0x16   :  { %288 = vperm.xlu0 %352, %v263_v15  }
  0x81   :  { %v56_v17 = vpop.permute.xlu0 %55 }
  0x82   :  { %v46_v19 = vpop.permute.xlu1 %45 }
  0x85   :  { %v51_v23 = vpop.permute.xlu0 %50 }
  0x86   :  { %v41_v28 = vpop.permute.xlu1 %40 }
  0x89   :  { %v170_v35 = vpop.permute.xlu0 %169 }
  0x8a   :  { %v175_v34 = vpop.permute.xlu1 %174 }
  0x8d   :  { %v267_v44 = vpop.permute.xlu0 %266 }
  0x8e   :  { %v272_v41 = vpop.permute.xlu1 %271 }
  0x91   :  { %v289_v56 = vpop.permute.xlu0 %288 }
  0x92   :  { %v294_v58 = vrot.slane %v289_v56, %v293_v54 }
  0xc8   :  { %v335_v18 = vpop.f32.mrf.mxu0 }
  0xc9   :  { %v146_v25 = vadd.f32 %v335_v18, %v46_v19 }
  0xca   :  { %v140_v20 = vpop.f32.mrf.mxu0 }
  0xcb   :  { %v141_v29 = vadd.f32 %v140_v20, %v41_v28  ;;  %v160_v31 = vmax.f32 %v146_v25, 0.0 }
  0xcc   :  { %v338_v21 = vpop.f32.mrf.mxu0 }
  0xcd   :  { %v156_v22 = vadd.f32 %v338_v21, %v56_v17  ;;  %v159_v32 = vmax.f32 %v141_v29, 0.0 }
  0xce   :  { %v150_v24 = vpop.f32.mrf.mxu0 }
  0xcf   :  { %v162_v26 = vmax.f32 %v156_v22, 0.0  ;;  %v151_v27 = vadd.f32 %v150_v24, %v51_v23 }
  0xd1   :  { %v161_v30 = vmax.f32 %v151_v27, 0.0  ;;  %339 = vmatprep.subr.mxu1 %v162_v26 }
  0xd2   :  { %340 = vmatpush3.msra.mxu1 %v162_v26 }
  0xd3   :  { %341 = vmatprep.subr.mxu1 %v161_v30 }
  0xd4   :  { %342 = vmatpush3.msra.mxu1 %v161_v30 }
  0xd5   :  { %343 = vmatprep.subr.mxu1 %v160_v31 }
  0xd6   :  { %344 = vmatpush3.msra.mxu1 %v160_v31 }
  0xd7   :  { %345 = vmatprep.subr.mxu1 %v159_v32 }
  0xd8   :  { %346 = vmatpush3.msra.mxu1 %v159_v32 }
  0xd9   :  { %348 = vmatmul.mubr.msk.f32.vlgmr.msra.gmra.mxu1 %vm177_vm1, %v164_v33 }
 0x199   :  { %v349_v36 = vpop.f32.mrf.mxu1 }
 0x19a   :  { %v256_v37 = vadd.f32 %v349_v36, %v175_v34 }
 0x19b   :  { %v250_v38 = vpop.f32.mrf.mxu1 }
 0x19c   :  { %v260_v39 = vmax.f32 %v256_v37, 0.0  ;;  %v251_v40 = vadd.f32 %v250_v38, %v170_v35 }
 0x19e   :  { %v275_v42 = vmul.f32 %v272_v41, %v260_v39  ;;  %v259_v43 = vmax.f32 %v251_v40, 0.0 }
 0x1a0   :  { %v274_v45 = vmul.f32 %v267_v44, %v259_v43  ;;  %v278_v46 = vsel %vm276_vm2, %v275_v42, 0.0 }
 0x1a2   :  { %v277_v47 = vsel %vm276_vm2, %v274_v45, 0.0 }
 0x1a3   :  { %v279_v49 = vadd.f32 %v278_v46, %v277_v47 }
 0x1a5   :  { %v280_v50 = vrot.slane %v279_v49, 4 }
 0x1a7   :  { %v281_v52 = vadd.f32 %v280_v50, %v279_v49 }
 0x1a9   :  { %v282_v53 = vrot.slane %v281_v52, 2 }
 0x1ab   :  { %v283_v55 = vadd.f32 %v282_v53, %v281_v52 }
 0x1ad   :  { %v284_v57 = vrot.slane %v283_v55, 1 }
 0x1af   :  { %v285_v59 = vadd.f32 %v284_v57, %v283_v55 }
 0x1b1   :  { %v295_v60 = vadd.f32 %v294_v58, %v285_v59 }
 0x1b3   :  { %354 = vtanh.f32 %v295_v60 }
 0x1c0   :  { %v355_v61 = vpop.eup %354 }
 0x1c1   :  { %298 = vst.msk [vmem:[#allocation3] sm:$0x1] %vm297_vm3, %v355_v61 }
 0x1c2   :  { %367 = shalt.err (!%p364_p4)
}
 0x1c3   :  { %308 = dma.vmem_to_hbm [thread:$0]  %s306_s27, 16, %s486_s7, [#allocation4]  }
 0x1c4   :  { %376 = dma.done.wait [#allocation4], 16  }
 0x1c5   :  { %377 = vsyncadd [#allocation4], 4294967280 }
 0x1c6   :  { %312 = vsyncpa [#allocation4], 1 }

</bundles_post_ra>
